<compile_context>
chip_gen: v5e
topology: v5e:2x2
jax: 0.10.0
libtpu: 0.0.40
codegen_flags: <defaults>
</compile_context>

<pallas_src>
import functools

import jax
import jax.numpy as jnp
import numpy as np
from jax import lax
from jax.experimental import pallas as pl
from jax.experimental.pallas import tpu as pltpu


# --------------------------- fused per-block kernel ---------------------------
def _dense_layer_kernel(x_ref, w1_ref, s1_ref, b1_ref,
                        wc_ref, sc_ref, bc_ref,
                        wt_ref, st1_ref, bt1_ref,
                        o_ref, *, nb, T, kt, VCg):
    """Processes nb samples (rows = nb*T frames); all intermediates stay in VMEM/vregs.

    Layouts: x_ref (rows, V*Cin), o_ref (rows, V*Cg) -- node axis folded into lanes.
    """
    f32 = jnp.float32
    cdt = w1_ref.dtype              # MXU operand dtype (bf16 default); accumulation is f32
    rows = nb * T
    pad = (kt - 1) // 2

    # ---- stage 1: bottleneck 1x1 conv (block-diag over nodes) + BN1 + ReLU ----
    y = jnp.dot(x_ref[...], w1_ref[...], preferred_element_type=f32)     # (rows, V*Cb) f32
    y = jnp.maximum(y * s1_ref[...] + b1_ref[...], 0.0).astype(cdt)      # bf16 straight out

    # ---- stage 2+3: residual + A-folded GCN in ONE lane-dense matmul ----------
    comb = jnp.dot(y, wc_ref[...], preferred_element_type=f32)           # (rows, 2*V*Cg) f32
    comb = comb * sc_ref[...] + bc_ref[...]                              # merged BN affine
    res = comb[:, :VCg]                                                  # 128-lane aligned split
    z = jnp.maximum(comb[:, VCg:], 0.0).astype(cdt)                      # BN_t0 + ReLU -> bf16

    # ---- stage 4: temporal (kt x 1) conv, no halo: roll + row-mask per tap ----
    conv = jnp.zeros((rows, VCg), f32)
    if kt > 1:
        # frame index within its sample (handles multi-sample blocks without a loop)
        t_in_sample = lax.broadcasted_iota(jnp.int32, (rows, 1), 0) % T
    for dt in range(kt):
        off = dt - pad                                                   # temporal offset
        tap = jnp.dot(z, wt_ref[dt], preferred_element_type=f32)         # (rows, V*Cg) f32
        if off != 0:
            tap = pltpu.roll(tap, shift=(-off) % rows, axis=0)           # tap[r] <- z[r+off]@W
            valid = jnp.logical_and(t_in_sample + off >= 0, t_in_sample + off < T)
            tap = jnp.where(valid, tap, 0.0)                             # zero-pad boundary rows
        conv = conv + tap

    # ---- BN_t1 + residual add + final ReLU (lane-dense store) -----------------
    out = jnp.maximum(conv * st1_ref[...] + bt1_ref[...] + res, 0.0)
    o_ref[...] = out.astype(o_ref.dtype)


# ------------------------------ forward wrapper --------------------------------
def _bn_affine(gamma, beta, mean, var, eps=1e-5):
    scale = gamma / jnp.sqrt(var + eps)
    shift = beta - mean * scale
    return scale, shift


def dense_layer_forward(x_ntvc, A, p, *, compute_dtype=jnp.bfloat16, samples_per_block=None):
    """x_ntvc: (N, T, V, Cin); A: (K, V, V). Returns (N, T, V, growth_rate) f32.

    compute_dtype controls the MXU operand dtype (bf16 default, f32 for exact checks);
    accumulation and all BN/ReLU epilogues stay f32.
    """
    f32 = jnp.float32
    N, T, V, Cin = x_ntvc.shape
    K = A.shape[0]
    kt, Cg, _ = p['w_tcn'].shape
    Cb = p['w_conv1'].shape[1]
    VCin, VCb, VCg = V * Cin, V * Cb, V * Cg

    # Fold BatchNorms + conv biases into per-channel scale/shift (inference mode).
    s1, b1 = _bn_affine(p['bn1_gamma'], p['bn1_beta'], p['bn1_mean'], p['bn1_var'])
    sr, br = _bn_affine(p['bnr_gamma'], p['bnr_beta'], p['bnr_mean'], p['bnr_var'])
    st0, bt0 = _bn_affine(p['bnt0_gamma'], p['bnt0_beta'], p['bnt0_mean'], p['bnt0_var'])
    st1, bt1 = _bn_affine(p['bnt1_gamma'], p['bnt1_beta'], p['bnt1_mean'], p['bnt1_var'])

    tile_v = lambda vec: jnp.tile(vec, V)                 # per-channel -> per (node, channel)
    eye_v = jnp.eye(V, dtype=f32)

    # Block-diagonal bottleneck 1x1 conv weight (V*Cin, V*Cb).
    w1_bd = jnp.kron(eye_v, p['w_conv1'])

    # Residual 1x1 conv as a block-diagonal (V*Cb, V*Cg); GCN weight with the adjacency
    # folded in: W_gcn_eff[v*Cb+i, w*Cg+c] = sum_k A[k,v,w] * w_gcn[i, k*Cg+c].
    w_res_bd = jnp.kron(eye_v, p['w_res'])
    w_gcn_eff = jnp.einsum('kvw,ikc->viwc', A,
                           p['w_gcn'].reshape(Cb, K, Cg)).reshape(VCb, VCg)
    w_comb = jnp.concatenate([w_res_bd, w_gcn_eff], axis=1)              # (V*Cb, 2*V*Cg)

    # Merged scale/shift for the combined matmul output:
    #   [:VCg]  -> BN_res applied to (y@w_res + b_res)
    #   [VCg:]  -> BN_t0 applied to the A-aggregated GCN pre-activation (+ aggregated b_gcn)
    z_bias = jnp.einsum('kvw,kc->wc', A, p['b_gcn'].reshape(K, Cg))      # (V, Cg)
    sc = jnp.concatenate([tile_v(sr), tile_v(st0)])
    bc = jnp.concatenate([tile_v(p['b_res'] * sr + br),
                          (z_bias * st0 + bt0).reshape(VCg)])
    s1_f, b1_f = tile_v(s1), tile_v(b1)
    st1_f = tile_v(st1)
    bt1_f = tile_v(p['b_tcn'] * st1 + bt1)

    # Temporal conv taps as block-diagonal (V*Cg, V*Cg) weights.
    wt_bd = jnp.stack([jnp.kron(eye_v, p['w_tcn'][dt]) for dt in range(kt)])   # (kt, VCg, VCg)

    # ---------------- batch blocking + VMEM budget --------------------------------
    cbytes = jnp.dtype(compute_dtype).itemsize
    w_bytes = ((VCin * VCb + VCb * 2 * VCg + kt * VCg * VCg) * cbytes
               + (2 * VCb + 2 * (2 * VCg) + 2 * VCg) * 4)

    def est_step_bytes(nb_):
        rows_ = nb_ * T
        act = rows_ * (VCb * (4 + cbytes)      # y (f32 epilogue + bf16 copy)
                       + 2 * VCg * 4           # comb (res | gcn pre-activation)
                       + VCg * cbytes          # z
                       + 2 * VCg * 4)          # conv accumulator + out
        io = 2 * rows_ * (VCin * cbytes + VCg * 4)   # double-buffered in/out blocks
        return int(act + io + w_bytes)

    # Default: ~2 grid steps (feeds both v7x TensorCores, amortizes step overhead on
    # single-TC v5e/v6e).  Auto-shrink the block to respect a conservative activation
    # budget (v7x has 64 MiB physical VMEM).
    target = samples_per_block if samples_per_block is not None else max(1, N // 2)
    divisors = [d for d in range(1, N + 1) if N % d == 0]
    nb = max(d for d in divisors if d <= max(1, min(target, N)))
    _ACT_BUDGET = 12 * 2**20
    while nb > 1 and est_step_bytes(nb) > _ACT_BUDGET:
        nb = max(d for d in divisors if d < nb)
    rows = nb * T
    grid = (N // nb,)
    vmem_limit = int(min(64 * 2**20, max(16 * 2**20, 2 * est_step_bytes(nb))))

    cast = lambda v: v.astype(compute_dtype)
    x2 = x_ntvc.reshape(N * T, VCin)                     # free host-side re-layout

    kernel = functools.partial(_dense_layer_kernel, nb=nb, T=T, kt=kt, VCg=VCg)
    c2 = lambda i: (0, 0)
    c3 = lambda i: (0, 0, 0)

    out2 = pl.pallas_call(
        kernel,
        out_shape=jax.ShapeDtypeStruct((N * T, VCg), f32),
        grid_spec=pltpu.PrefetchScalarGridSpec(
            num_scalar_prefetch=0,
            grid=grid,
            in_specs=[
                pl.BlockSpec((rows, VCin), lambda i: (i, 0)),   # x (lane-packed)
                pl.BlockSpec((VCin, VCb), c2),                  # block-diag w_conv1
                pl.BlockSpec((1, VCb), c2),                     # BN1 scale
                pl.BlockSpec((1, VCb), c2),                     # BN1 shift
                pl.BlockSpec((VCb, 2 * VCg), c2),               # [block-diag w_res | A-folded w_gcn]
                pl.BlockSpec((1, 2 * VCg), c2),                 # merged scale
                pl.BlockSpec((1, 2 * VCg), c2),                 # merged shift
                pl.BlockSpec((kt, VCg, VCg), c3),               # block-diag temporal taps
                pl.BlockSpec((1, VCg), c2),                     # BN_t1 scale
                pl.BlockSpec((1, VCg), c2),                     # BN_t1 shift (+b_tcn)
            ],
            out_specs=pl.BlockSpec((rows, VCg), lambda i: (i, 0)),   # lane-dense store
        ),
        compiler_params=pltpu.CompilerParams(
            dimension_semantics=("parallel",),
            vmem_limit_bytes=vmem_limit,
        ),
    )(cast(x2), cast(w1_bd), s1_f.reshape(1, VCb), b1_f.reshape(1, VCb),
      cast(w_comb), sc.reshape(1, 2 * VCg), bc.reshape(1, 2 * VCg),
      cast(wt_bd), st1_f.reshape(1, VCg), bt1_f.reshape(1, VCg))

    return out2.reshape(N, T, V, Cg)                     # free metadata reshape


# ------------------------------ pure-JAX reference ------------------------------
def reference_forward(x, A, p, eps=1e-5):
    N, T, V, Cin = x.shape
    K = A.shape[0]
    kt, Cg, _ = p['w_tcn'].shape

    def bn(h, g_, b_, m_, v_):
        return (h - m_) / jnp.sqrt(v_ + eps) * g_ + b_

    y1 = jax.nn.relu(bn(jnp.einsum('ntvi,io->ntvo', x, p['w_conv1']),
                        p['bn1_gamma'], p['bn1_beta'], p['bn1_mean'], p['bn1_var']))
    res = bn(jnp.einsum('ntvi,io->ntvo', y1, p['w_res']) + p['b_res'],
             p['bnr_gamma'], p['bnr_beta'], p['bnr_mean'], p['bnr_var'])
    g = jnp.einsum('ntvi,io->ntvo', y1, p['w_gcn']) + p['b_gcn']
    g5 = g.reshape(N, T, V, K, Cg)
    z = jnp.einsum('ntvkc,kvw->ntwc', g5, A)
    z = jax.nn.relu(bn(z, p['bnt0_gamma'], p['bnt0_beta'], p['bnt0_mean'], p['bnt0_var']))
    pad = (kt - 1) // 2
    zp = jnp.pad(z, ((0, 0), (pad, pad), (0, 0), (0, 0)))
    conv = sum(jnp.einsum('ntvc,cd->ntvd', zp[:, dt:dt + T], p['w_tcn'][dt])
               for dt in range(kt)) + p['b_tcn']
    out = bn(conv, p['bnt1_gamma'], p['bnt1_beta'], p['bnt1_mean'], p['bnt1_var'])
    return jax.nn.relu(out + res)


if __name__ == "__main__":
    # Small shapes consistent with the module's forward (PyTorch NCHW (N,C,T,V) = (2,4,8,16)).
    N, Cin, T, V = 2, 4, 8, 16
    growth_rate, bn_size = 8, 2
    K, kt = 3, 3                               # kernel_size = (temporal=3, spatial=3)
    Cb, Cg = bn_size * growth_rate, growth_rate

    key = jax.random.PRNGKey(0)
    ks = jax.random.split(key, 32)
    f32 = jnp.float32

    def rn(k, shape, s=0.1):
        return (jax.random.normal(k, shape) * s).astype(f32)

    def pos(k, shape):
        return jax.random.uniform(k, shape, minval=0.5, maxval=1.5).astype(f32)

    x = rn(ks[0], (N, T, V, Cin), 1.0)         # layout: (N, T, V, C)
    A = rn(ks[1], (K, V, V), 0.3)

    params = dict(
        w_conv1=rn(ks[2], (Cin, Cb)),
        bn1_gamma=pos(ks[3], (Cb,)), bn1_beta=rn(ks[4], (Cb,)),
        bn1_mean=rn(ks[5], (Cb,)), bn1_var=pos(ks[6], (Cb,)),
        w_res=rn(ks[7], (Cb, Cg)), b_res=rn(ks[8], (Cg,)),
        bnr_gamma=pos(ks[9], (Cg,)), bnr_beta=rn(ks[10], (Cg,)),
        bnr_mean=rn(ks[11], (Cg,)), bnr_var=pos(ks[12], (Cg,)),
        w_gcn=rn(ks[13], (Cb, K * Cg)), b_gcn=rn(ks[14], (K * Cg,)),
        bnt0_gamma=pos(ks[15], (Cg,)), bnt0_beta=rn(ks[16], (Cg,)),
        bnt0_mean=rn(ks[17], (Cg,)), bnt0_var=pos(ks[18], (Cg,)),
        w_tcn=rn(ks[19], (kt, Cg, Cg)), b_tcn=rn(ks[20], (Cg,)),
        bnt1_gamma=pos(ks[21], (Cg,)), bnt1_beta=rn(ks[22], (Cg,)),
        bnt1_mean=rn(ks[23], (Cg,)), bnt1_var=pos(ks[24], (Cg,)),
    )

    ref = jax.block_until_ready(reference_forward(x, A, params))

    # f32 MXU operands: tight tolerance (validates the fused/folded semantics exactly).
    out_f32 = jax.block_until_ready(
        dense_layer_forward(x, A, params, compute_dtype=jnp.float32))
    assert out_f32.shape == (N, T, V, Cg)
    np.testing.assert_allclose(np.asarray(out_f32), np.asarray(ref), rtol=2e-4, atol=2e-4)

    # Default path: bf16 MXU operands, ~2 grid steps.
    out_bf16 = jax.block_until_ready(dense_layer_forward(x, A, params))
    np.testing.assert_allclose(np.asarray(out_bf16), np.asarray(ref), rtol=5e-2, atol=5e-2)

    # Whole batch in one grid step (v5e/v6e style): exercises multi-sample blocks and the
    # per-sample temporal boundary masking.
    out_1step = jax.block_until_ready(
        dense_layer_forward(x, A, params, compute_dtype=jnp.float32, samples_per_block=N))
    np.testing.assert_allclose(np.asarray(out_1step), np.asarray(ref), rtol=2e-4, atol=2e-4)

    print("KERNEL_OK")
</pallas_src>

<mosaic_0001>
module attributes {stable_mosaic.version = 11 : i64} {
  func.func @_dense_layer_kernel(%arg0: i32, %arg1: memref<8x64xf32, #tpu.memory_space<vmem>>, %arg2: memref<64x256xf32, #tpu.memory_space<vmem>>, %arg3: memref<1x256xf32, #tpu.memory_space<vmem>>, %arg4: memref<1x256xf32, #tpu.memory_space<vmem>>, %arg5: memref<256x256xf32, #tpu.memory_space<vmem>>, %arg6: memref<1x256xf32, #tpu.memory_space<vmem>>, %arg7: memref<1x256xf32, #tpu.memory_space<vmem>>, %arg8: memref<3x128x128xf32, #tpu.memory_space<vmem>>, %arg9: memref<1x128xf32, #tpu.memory_space<vmem>>, %arg10: memref<1x128xf32, #tpu.memory_space<vmem>>, %arg11: memref<8x128xf32, #tpu.memory_space<vmem>>) attributes {dimension_semantics = [#tpu.dimension_semantics<parallel>], iteration_bounds = array<i64: 2>, scalar_prefetch = 0 : i64, scratch_operands = 0 : i64, tpu.core_type = #tpu.core_type<tc>, window_params = [{transform_indices = @transform_0, window_bounds = array<i64: 8, 64>}, {pipeline_mode = #tpu.pipeline_mode<synchronous>, transform_indices = @transform_1, window_bounds = array<i64: 64, 256>}, {pipeline_mode = #tpu.pipeline_mode<synchronous>, transform_indices = @transform_2, window_bounds = array<i64: 1, 256>}, {pipeline_mode = #tpu.pipeline_mode<synchronous>, transform_indices = @transform_3, window_bounds = array<i64: 1, 256>}, {pipeline_mode = #tpu.pipeline_mode<synchronous>, transform_indices = @transform_4, window_bounds = array<i64: 256, 256>}, {pipeline_mode = #tpu.pipeline_mode<synchronous>, transform_indices = @transform_5, window_bounds = array<i64: 1, 256>}, {pipeline_mode = #tpu.pipeline_mode<synchronous>, transform_indices = @transform_6, window_bounds = array<i64: 1, 256>}, {pipeline_mode = #tpu.pipeline_mode<synchronous>, transform_indices = @transform_7, window_bounds = array<i64: 3, 128, 128>}, {pipeline_mode = #tpu.pipeline_mode<synchronous>, transform_indices = @transform_8, window_bounds = array<i64: 1, 128>}, {pipeline_mode = #tpu.pipeline_mode<synchronous>, transform_indices = @transform_9, window_bounds = array<i64: 1, 128>}, {transform_indices = @transform_10, window_bounds = array<i64: 8, 128>}]} {
    %c0 = arith.constant 0 : index
    %c0_0 = arith.constant 0 : index
    %0 = vector.load %arg1[%c0, %c0_0] : memref<8x64xf32, #tpu.memory_space<vmem>>, vector<8x64xf32>
    %c0_1 = arith.constant 0 : index
    %c0_2 = arith.constant 0 : index
    %1 = vector.load %arg2[%c0_1, %c0_2] : memref<64x256xf32, #tpu.memory_space<vmem>>, vector<64x256xf32>
    %cst = arith.constant dense<0.000000e+00> : vector<8x256xf32>
    %2 = tpu.matmul %0, %1, %cst {dimension_numbers = #tpu.dot_dimension_numbers<[1], [0], [0], [1], [0, 0, 1, 1], [], []>} : vector<8x64xf32>, vector<64x256xf32>, vector<8x256xf32> -> vector<8x256xf32>
    %c0_3 = arith.constant 0 : index
    %c0_4 = arith.constant 0 : index
    %3 = vector.load %arg3[%c0_3, %c0_4] : memref<1x256xf32, #tpu.memory_space<vmem>>, vector<1x256xf32>
    %4 = vector.broadcast %3 : vector<1x256xf32> to vector<8x256xf32>
    %5 = arith.mulf %2, %4 : vector<8x256xf32>
    %c0_5 = arith.constant 0 : index
    %c0_6 = arith.constant 0 : index
    %6 = vector.load %arg4[%c0_5, %c0_6] : memref<1x256xf32, #tpu.memory_space<vmem>>, vector<1x256xf32>
    %7 = vector.broadcast %6 : vector<1x256xf32> to vector<8x256xf32>
    %8 = arith.addf %5, %7 : vector<8x256xf32>
    %cst_7 = arith.constant 0.000000e+00 : f32
    %9 = vector.broadcast %cst_7 : f32 to vector<8x256xf32>
    %10 = arith.maximumf %8, %9 : vector<8x256xf32>
    %c0_8 = arith.constant 0 : index
    %c0_9 = arith.constant 0 : index
    %11 = vector.load %arg5[%c0_8, %c0_9] : memref<256x256xf32, #tpu.memory_space<vmem>>, vector<256x256xf32>
    %cst_10 = arith.constant dense<0.000000e+00> : vector<8x256xf32>
    %12 = tpu.matmul %10, %11, %cst_10 {dimension_numbers = #tpu.dot_dimension_numbers<[1], [0], [0], [1], [0, 0, 1, 1], [], []>} : vector<8x256xf32>, vector<256x256xf32>, vector<8x256xf32> -> vector<8x256xf32>
    %c0_11 = arith.constant 0 : index
    %c0_12 = arith.constant 0 : index
    %13 = vector.load %arg6[%c0_11, %c0_12] : memref<1x256xf32, #tpu.memory_space<vmem>>, vector<1x256xf32>
    %14 = vector.broadcast %13 : vector<1x256xf32> to vector<8x256xf32>
    %15 = arith.mulf %12, %14 : vector<8x256xf32>
    %c0_13 = arith.constant 0 : index
    %c0_14 = arith.constant 0 : index
    %16 = vector.load %arg7[%c0_13, %c0_14] : memref<1x256xf32, #tpu.memory_space<vmem>>, vector<1x256xf32>
    %17 = vector.broadcast %16 : vector<1x256xf32> to vector<8x256xf32>
    %18 = arith.addf %15, %17 : vector<8x256xf32>
    %19 = vector.extract_strided_slice %18 {offsets = [0, 0], sizes = [8, 128], strides = [1, 1]} : vector<8x256xf32> to vector<8x128xf32>
    %20 = vector.extract_strided_slice %18 {offsets = [0, 128], sizes = [8, 128], strides = [1, 1]} : vector<8x256xf32> to vector<8x128xf32>
    %cst_15 = arith.constant 0.000000e+00 : f32
    %21 = vector.broadcast %cst_15 : f32 to vector<8x128xf32>
    %22 = arith.maximumf %20, %21 : vector<8x128xf32>
    %cst_16 = arith.constant 0.000000e+00 : f32
    %23 = vector.broadcast %cst_16 : f32 to vector<8x128xf32>
    %24 = tpu.iota {dimensions = array<i32: 0>} : vector<8x1xi32>
    %c8_i32 = arith.constant 8 : i32
    %c0_i32 = arith.constant 0 : i32
    %25 = arith.cmpi eq, %c8_i32, %c0_i32 : i32
    %c1_i32 = arith.constant 1 : i32
    %26 = arith.select %25, %c1_i32, %c8_i32 : i32
    %27 = vector.broadcast %26 : i32 to vector<8x1xi32>
    %28 = arith.remsi %24, %27 : vector<8x1xi32>
    %c0_i32_17 = arith.constant 0 : i32
    %29 = vector.broadcast %c0_i32_17 : i32 to vector<8x1xi32>
    %30 = arith.cmpi ne, %28, %29 : vector<8x1xi32>
    %c0_i32_18 = arith.constant 0 : i32
    %31 = vector.broadcast %c0_i32_18 : i32 to vector<8x1xi32>
    %32 = arith.cmpi slt, %28, %31 : vector<8x1xi32>
    %c0_i32_19 = arith.constant 0 : i32
    %33 = arith.cmpi slt, %26, %c0_i32_19 : i32
    %34 = vector.broadcast %33 : i1 to vector<8x1xi1>
    %35 = vector.broadcast %34 : vector<8x1xi1> to vector<8x1xi1>
    %36 = arith.xori %32, %35 : vector<8x1xi1>
    %37 = arith.andi %36, %30 : vector<8x1xi1>
    %38 = vector.broadcast %26 : i32 to vector<8x1xi32>
    %39 = arith.addi %28, %38 : vector<8x1xi32>
    %40 = arith.select %37, %39, %28 : vector<8x1xi1>, vector<8x1xi32>
    %c0_20 = arith.constant 0 : index
    %c0_21 = arith.constant 0 : index
    %c0_22 = arith.constant 0 : index
    %41 = vector.load %arg8[%c0_20, %c0_21, %c0_22] : memref<3x128x128xf32, #tpu.memory_space<vmem>>, vector<1x128x128xf32>
    %42 = vector.shape_cast %41 : vector<1x128x128xf32> to vector<128x128xf32>
    %cst_23 = arith.constant dense<0.000000e+00> : vector<8x128xf32>
    %43 = tpu.matmul %22, %42, %cst_23 {dimension_numbers = #tpu.dot_dimension_numbers<[1], [0], [0], [1], [0, 0, 1, 1], [], []>} : vector<8x128xf32>, vector<128x128xf32>, vector<8x128xf32> -> vector<8x128xf32>
    %c1_i32_24 = arith.constant 1 : i32
    %44 = tpu.dynamic_rotate %43 by %c1_i32_24 dim 0 : vector<8x128xf32>, i32 -> vector<8x128xf32>
    %c-1_i32 = arith.constant -1 : i32
    %45 = vector.broadcast %c-1_i32 : i32 to vector<8x1xi32>
    %46 = arith.addi %40, %45 : vector<8x1xi32>
    %c0_i32_25 = arith.constant 0 : i32
    %47 = vector.broadcast %c0_i32_25 : i32 to vector<8x1xi32>
    %48 = arith.cmpi sge, %46, %47 : vector<8x1xi32>
    %c-1_i32_26 = arith.constant -1 : i32
    %49 = vector.broadcast %c-1_i32_26 : i32 to vector<8x1xi32>
    %50 = arith.addi %40, %49 : vector<8x1xi32>
    %c8_i32_27 = arith.constant 8 : i32
    %51 = vector.broadcast %c8_i32_27 : i32 to vector<8x1xi32>
    %52 = arith.cmpi slt, %50, %51 : vector<8x1xi32>
    %53 = arith.andi %48, %52 : vector<8x1xi1>
    %cst_28 = arith.constant 0.000000e+00 : f32
    %54 = vector.shape_cast %53 : vector<8x1xi1> to vector<8x1xi1>
    %55 = vector.broadcast %54 : vector<8x1xi1> to vector<8x128xi1>
    %56 = vector.broadcast %cst_28 : f32 to vector<8x128xf32>
    %57 = arith.select %55, %44, %56 : vector<8x128xi1>, vector<8x128xf32>
    %58 = arith.addf %23, %57 : vector<8x128xf32>
    %c1 = arith.constant 1 : index
    %c0_29 = arith.constant 0 : index
    %c0_30 = arith.constant 0 : index
    %59 = vector.load %arg8[%c1, %c0_29, %c0_30] : memref<3x128x128xf32, #tpu.memory_space<vmem>>, vector<1x128x128xf32>
    %60 = vector.shape_cast %59 : vector<1x128x128xf32> to vector<128x128xf32>
    %cst_31 = arith.constant dense<0.000000e+00> : vector<8x128xf32>
    %61 = tpu.matmul %22, %60, %cst_31 {dimension_numbers = #tpu.dot_dimension_numbers<[1], [0], [0], [1], [0, 0, 1, 1], [], []>} : vector<8x128xf32>, vector<128x128xf32>, vector<8x128xf32> -> vector<8x128xf32>
    %62 = arith.addf %58, %61 : vector<8x128xf32>
    %c2 = arith.constant 2 : index
    %c0_32 = arith.constant 0 : index
    %c0_33 = arith.constant 0 : index
    %63 = vector.load %arg8[%c2, %c0_32, %c0_33] : memref<3x128x128xf32, #tpu.memory_space<vmem>>, vector<1x128x128xf32>
    %64 = vector.shape_cast %63 : vector<1x128x128xf32> to vector<128x128xf32>
    %cst_34 = arith.constant dense<0.000000e+00> : vector<8x128xf32>
    %65 = tpu.matmul %22, %64, %cst_34 {dimension_numbers = #tpu.dot_dimension_numbers<[1], [0], [0], [1], [0, 0, 1, 1], [], []>} : vector<8x128xf32>, vector<128x128xf32>, vector<8x128xf32> -> vector<8x128xf32>
    %c7_i32 = arith.constant 7 : i32
    %66 = tpu.dynamic_rotate %65 by %c7_i32 dim 0 : vector<8x128xf32>, i32 -> vector<8x128xf32>
    %c1_i32_35 = arith.constant 1 : i32
    %67 = vector.broadcast %c1_i32_35 : i32 to vector<8x1xi32>
    %68 = arith.addi %40, %67 : vector<8x1xi32>
    %c0_i32_36 = arith.constant 0 : i32
    %69 = vector.broadcast %c0_i32_36 : i32 to vector<8x1xi32>
    %70 = arith.cmpi sge, %68, %69 : vector<8x1xi32>
    %c1_i32_37 = arith.constant 1 : i32
    %71 = vector.broadcast %c1_i32_37 : i32 to vector<8x1xi32>
    %72 = arith.addi %40, %71 : vector<8x1xi32>
    %c8_i32_38 = arith.constant 8 : i32
    %73 = vector.broadcast %c8_i32_38 : i32 to vector<8x1xi32>
    %74 = arith.cmpi slt, %72, %73 : vector<8x1xi32>
    %75 = arith.andi %70, %74 : vector<8x1xi1>
    %cst_39 = arith.constant 0.000000e+00 : f32
    %76 = vector.shape_cast %75 : vector<8x1xi1> to vector<8x1xi1>
    %77 = vector.broadcast %76 : vector<8x1xi1> to vector<8x128xi1>
    %78 = vector.broadcast %cst_39 : f32 to vector<8x128xf32>
    %79 = arith.select %77, %66, %78 : vector<8x128xi1>, vector<8x128xf32>
    %80 = arith.addf %62, %79 : vector<8x128xf32>
    %c0_40 = arith.constant 0 : index
    %c0_41 = arith.constant 0 : index
    %81 = vector.load %arg9[%c0_40, %c0_41] : memref<1x128xf32, #tpu.memory_space<vmem>>, vector<1x128xf32>
    %82 = vector.broadcast %81 : vector<1x128xf32> to vector<8x128xf32>
    %83 = arith.mulf %80, %82 : vector<8x128xf32>
    %c0_42 = arith.constant 0 : index
    %c0_43 = arith.constant 0 : index
    %84 = vector.load %arg10[%c0_42, %c0_43] : memref<1x128xf32, #tpu.memory_space<vmem>>, vector<1x128xf32>
    %85 = vector.broadcast %84 : vector<1x128xf32> to vector<8x128xf32>
    %86 = arith.addf %83, %85 : vector<8x128xf32>
    %87 = arith.addf %86, %19 : vector<8x128xf32>
    %cst_44 = arith.constant 0.000000e+00 : f32
    %88 = vector.broadcast %cst_44 : f32 to vector<8x128xf32>
    %89 = arith.maximumf %87, %88 : vector<8x128xf32>
    %c0_45 = arith.constant 0 : index
    %c0_46 = arith.constant 0 : index
    %90 = vector.load %arg11[%c0_45, %c0_46] : memref<8x128xf32, #tpu.memory_space<vmem>>, vector<8x128xf32>
    tpu.vector_store %arg11[%c0_45, %c0_46], %89 {strides = array<i32>} : memref<8x128xf32, #tpu.memory_space<vmem>>, vector<8x128xf32>,
    return
  }
  func.func @transform_0(%arg0: i32) -> (i32, i32) {
    %c0_i32 = arith.constant 0 : i32
    %c0_i32_0 = arith.constant 0 : i32
    return %arg0, %c0_i32 : i32, i32
  }
  func.func @transform_1(%arg0: i32) -> (i32, i32) {
    %c0_i32 = arith.constant 0 : i32
    %c0_i32_0 = arith.constant 0 : i32
    %c0_i32_1 = arith.constant 0 : i32
    return %c0_i32, %c0_i32_0 : i32, i32
  }
  func.func @transform_2(%arg0: i32) -> (i32, i32) {
    %c0_i32 = arith.constant 0 : i32
    %c0_i32_0 = arith.constant 0 : i32
    %c0_i32_1 = arith.constant 0 : i32
    return %c0_i32, %c0_i32_0 : i32, i32
  }
  func.func @transform_3(%arg0: i32) -> (i32, i32) {
    %c0_i32 = arith.constant 0 : i32
    %c0_i32_0 = arith.constant 0 : i32
    %c0_i32_1 = arith.constant 0 : i32
    return %c0_i32, %c0_i32_0 : i32, i32
  }
  func.func @transform_4(%arg0: i32) -> (i32, i32) {
    %c0_i32 = arith.constant 0 : i32
    %c0_i32_0 = arith.constant 0 : i32
    %c0_i32_1 = arith.constant 0 : i32
    return %c0_i32, %c0_i32_0 : i32, i32
  }
  func.func @transform_5(%arg0: i32) -> (i32, i32) {
    %c0_i32 = arith.constant 0 : i32
    %c0_i32_0 = arith.constant 0 : i32
    %c0_i32_1 = arith.constant 0 : i32
    return %c0_i32, %c0_i32_0 : i32, i32
  }
  func.func @transform_6(%arg0: i32) -> (i32, i32) {
    %c0_i32 = arith.constant 0 : i32
    %c0_i32_0 = arith.constant 0 : i32
    %c0_i32_1 = arith.constant 0 : i32
    return %c0_i32, %c0_i32_0 : i32, i32
  }
  func.func @transform_7(%arg0: i32) -> (i32, i32, i32) {
    %c0_i32 = arith.constant 0 : i32
    %c0_i32_0 = arith.constant 0 : i32
    %c0_i32_1 = arith.constant 0 : i32
    %c0_i32_2 = arith.constant 0 : i32
    return %c0_i32, %c0_i32_0, %c0_i32_1 : i32, i32, i32
  }
  func.func @transform_8(%arg0: i32) -> (i32, i32) {
    %c0_i32 = arith.constant 0 : i32
    %c0_i32_0 = arith.constant 0 : i32
    %c0_i32_1 = arith.constant 0 : i32
    return %c0_i32, %c0_i32_0 : i32, i32
  }
  func.func @transform_9(%arg0: i32) -> (i32, i32) {
    %c0_i32 = arith.constant 0 : i32
    %c0_i32_0 = arith.constant 0 : i32
    %c0_i32_1 = arith.constant 0 : i32
    return %c0_i32, %c0_i32_0 : i32, i32
  }
  func.func @transform_10(%arg0: i32) -> (i32, i32) {
    %c0_i32 = arith.constant 0 : i32
    %c0_i32_0 = arith.constant 0 : i32
    return %arg0, %c0_i32 : i32, i32
  }
}

</mosaic_0001>

<bundles_post_ra>
// kernel: tpu_custom_call.1
= control target key start
LH: loop header
LB: loop body
LE: loop exit
PB: predicated region body
PF: predicated region fallthrough
CT: control target
= control target key end

     0   :  { %s1628_s0 = inlined_call_operand.hbm [shape: f32[16,64], index: 0, kind: input, shape index: {}]   ;;  %s1629_s1 = inlined_call_operand.hbm [shape: f32[64,256], index: 1, kind: input, shape index: {}]   ;;  %s1630_s2 = inlined_call_operand.hbm [shape: f32[1,256], index: 2, kind: input, shape index: {}]   ;;  %s1631_s3 = inlined_call_operand.vmem [shape: f32[1,256], index: 3, kind: input, shape index: {}]   ;;  %s1632_s4 = inlined_call_operand.hbm [shape: f32[256,256], index: 4, kind: input, shape index: {}]   ;;  %s1633_s5 = inlined_call_operand.vmem [shape: f32[1,256], index: 5, kind: input, shape index: {}]   ;;  %s1634_s6 = inlined_call_operand.hbm [shape: f32[1,256], index: 6, kind: input, shape index: {}]   ;;  %s1635_s7 = inlined_call_operand.hbm [shape: f32[3,128,128], index: 7, kind: input, shape index: {}]   ;;  %s1636_s8 = inlined_call_operand.vmem [shape: f32[1,128], index: 8, kind: input, shape index: {}]   ;;  %s1637_s9 = inlined_call_operand.vmem [shape: f32[1,128], index: 9, kind: input, shape index: {}]   ;;  %s1638_s10 = inlined_call_operand.hbm [shape: f32[16,128], index: 10, kind: output, shape index: {}]  }
   0x1   :  { %1639 = sst [smem:[#allocation19_spill]] %s1629_s1 }
   0x2   :  { %1640 = sst [smem:[#allocation20_spill]] %s1630_s2 }
   0x3   :  { %1641 = sst [smem:[#allocation21_spill]] %s1632_s4 }
   0x4   :  { %1642 = sst [smem:[#allocation22_spill]] %s1634_s6 }
   0x5   :  { %15 = vsyncpa [#allocation3], 0 }
   0x6   :  { %17 = vsyncpa [#allocation3 + $0x1], 0 }
   0x7   :  { %18 = vsyncpa [#allocation6], 0 }
   0x8   :  { %19 = vsyncpa [#allocation9], 0 }
   0x9   :  { %20 = vsyncpa [#allocation12], 0 }
   0xa   :  { %21 = vsyncpa [#allocation4], 0 }
   0xb   :  { %23 = vsyncpa [#allocation4 + $0x1], 0  ;;  %s1437_s13 = smov 0   ;;  %s1439_s14 = smov 0  }
   0xc   :  { %s1441_s15 = smov 0   ;;  %s1443_s16 = smov 0  }
   0xd LB: > { %s1643_s1 = sld [smem:[#allocation19_spill]]  ;;  %s1461_s20 = sadd.s32 4294967295, %s1371_s16   ;;  %s1371_s16 = sphi %s1443_s16, %s1657_s16   ;;  %s1367_s15 = sphi %s1441_s15, %s1656_s15   ;;  %s1363_s14 = sphi %s1439_s14, %s1655_s14   ;;  %s1359_s13 = sphi %s1437_s13, %s1654_s13  }
   0xe   : > { %p987_p0 = scmp.ge.s32.totalorder %s1371_s16, 1  ;;  %p50_p1 = scmp.eq.s32.totalorder %s1461_s20, 0 }
   0xf   : > { %p275_p2 = scmp.lt.s32.totalorder %s1371_s16, 3  ;;  %s1373_s22 = smov [#allocation5]  }
  0x10   : > { %s288_s23 = sshll.u32 %s1373_s22, 4  ;;  %s1645_s4 = sld [smem:[#allocation21_spill]]  ;;  %s289_s23 = int_to_ptr.vmem [resolvable:$true] %s288_s23 }
  0x11   : > { %p1466_p3 = pnand %p987_p0, %p275_p2  ;;  %s1647_s2 = sld [smem:[#allocation20_spill]] }
  0x12   : > { %s1374_s11 = smov [#allocation8]   ;;  %s1375_s17 = smov 256  }
  0x13   : > { %s286_s19 = sshll.u32 %s1643_s1, 4  ;;  %p1034_p4 = pneg %p1466_p3  ;;  %s287_s19 = int_to_ptr.hbm [resolvable:$true] %s286_s19 }
  0x14   : > { %s317_s12 = sshll.u32 %s1374_s11, 4  ;;  %s1376_s18 = smov 16   ;;  %s318_s12 = int_to_ptr.vmem [resolvable:$true] %s317_s12 }
  0x15   : > { %p1478_p6 = pnand %p1034_p4, %p50_p1  ;;  %s1648_s6 = sld [smem:[#allocation22_spill]] }
  0x16   : > { %s315_s26 = sshll.u32 %s1645_s4, 4  ;;  %s1377_s1 = smov [#allocation7]   ;;  %s316_s26 = int_to_ptr.hbm [resolvable:$true] %s315_s26 }
  0x17   : > { %s301_s30 = sshll.u32 %s1647_s2, 4  ;;  %s303_s4 = sshll.u32 %s1377_s1, 4  ;;  %s302_s30 = int_to_ptr.hbm [resolvable:$true] %s301_s30  ;;  %s304_s4 = int_to_ptr.vmem [resolvable:$true] %s303_s4 }
  0x18   : > { %1037 = dma.hbm_to_vmem [thread:$0]  (!%p1478_p6), %s287_s19, 2048, %s289_s23, [#allocation6], %s1375_s17, %s1375_s17, %s1376_s18  }
  0x19   : > { %1043 = dma.hbm_to_vmem [thread:$0]  (!%p1478_p6), %s316_s26, 8192, %s318_s12, [#allocation9], %s1375_s17, %s1375_s17, %s1376_s18  }
  0x1a   : > { %1040 = dma.hbm_to_vmem [thread:$0]  (!%p1478_p6), %s302_s30, 32, %s304_s4, [#allocation6]  }
  0x1b   : > { %s333_s25 = sshll.u32 %s1648_s6, 4  ;;  %s1378_s19 = smov [#allocation10]   ;;  %s334_s25 = int_to_ptr.hbm [resolvable:$true] %s333_s25 }
  0x1c   : > { %s335_s23 = sshll.u32 %s1378_s19, 4  ;;  %s344_s29 = sshll.u32 %s1635_s7, 4  ;;  %s336_s23 = int_to_ptr.vmem [resolvable:$true] %s335_s23  ;;  %s345_s29 = int_to_ptr.hbm [resolvable:$true] %s344_s29 }
  0x1d   : > { %1046 = dma.hbm_to_vmem [thread:$0]  (!%p1478_p6), %s334_s25, 32, %s336_s23, [#allocation9]  }
  0x1e   : > { %s1379_s1 = smov [#allocation11]   ;;  %s1380_s30 = smov 128  }
  0x1f   : > { %s346_s4 = sshll.u32 %s1379_s1, 4  ;;  %s1381_s11 = smov 8   ;;  %s347_s4 = int_to_ptr.vmem [resolvable:$true] %s346_s4 }
  0x20   : > { %1049 = dma.hbm_to_vmem [thread:$0]  (!%p1478_p6), %s345_s29, 6144, %s347_s4, [#allocation12], %s1380_s30, %s1380_s30, %s1381_s11  }
  0x21   : > { %s986_s12 = sadd.s32 4294967294, %s1371_s16   ;;  %s1503_s17 = sadd.s32 1, %s1371_s16  }
  0x22   : > { %s36_s18 = sadd.s32 1, %s1367_s15  ;;  %s33_s22 = ssub.s32 %s1371_s16, %s1503_s17 }
  0x23   : > { %p43_p7 = scmp.ne.s32.totalorder %s1367_s15, %s1363_s14  ;;  %p34_p8 = scmp.eq.s32.totalorder %s33_s22, 0 }
  0x24   : > { %p44_p9 = scmp.eq.s32.totalorder %s1371_s16, 0  ;;  %p49_p10 = scmp.ne.s32.totalorder %s1363_s14, %s1359_s13 }
  0x25   : > { %p262_p11 = scmp.eq.s32.totalorder %s1461_s20, 1  ;;  %p268_p0 = scmp.eq.s32.totalorder %s986_s12, 1 }
  0x26   : > { %s1515_s24 = scalar_select %p34_p8, %s1367_s15, %s36_s18  }
  0x27   : > { %p1519_p12 = por %p50_p1, %p49_p10  ;;  %p1523_p13 = por %p262_p11, %p43_p7 }
  0x28   : > { %p45_p2 = por %p44_p9, %p43_p7  ;;  %s366_s19 = sand.u32 1, %s1367_s15  }
  0x29   : > { %p1528_p4 = por %p268_p0, %p49_p10  ;;  %p1063_p6 = scmp.lt.s32.totalorder %s1371_s16, 2 }
  0x2a   : > { %s994_s26 = sshll.u32 %s366_s19, 3  ;;  %s995_s28 = sshll.u32 %s1371_s16, 3 }
  0x2b   : > { %s374_s4 = scalar_lea.hbm %s1628_s0, %s995_s28  ;;  %s370_s11 = scalar_lea.vmem [#allocation2], %s994_s26 }
  0x2c   : > { %s376_s30 = sshll.u32 %s374_s4, 4  ;;  %s378_s18 = sshll.u32 %s370_s11, 4  ;;  %s377_s30 = int_to_ptr.hbm [resolvable:$true] %s376_s30  ;;  %s379_s18 = int_to_ptr.vmem [resolvable:$true] %s378_s18 }
  0x2d   : > { %p1537_p8 = pnand %p1063_p6, %p45_p2  ;;  %s367_s22 = scalar_lea.sflag [#allocation3], %s366_s19 }
  0x2e   : > { %s1263_s2 = sshra.s32 %s377_s30, 4  ;;  %s1270_s26 = scalar_lea.hbm %s1628_s0, 16  ;;  %s1264_s2 = int_to_ptr.hbm [resolvable:$true] %s1263_s2 }
  0x2f   : > { %s1265_s6 = scalar_lea.hbm %s1264_s2, 8  ;;  %p1267_p9 = pneg %p1537_p8 }
  0x30   : > { %p1266_p7 = scmp.ne.s32.totalorder %s1264_s2, %s1265_s6  ;;  %p1271_p0 = scmp.lt.s32.totalorder %s1264_s2, %s1628_s0 }
  0x31   : > { %p1272_p2 = scmp.lt.s32.totalorder %s1270_s26, %s1265_s6 }
  0x32   : > { %p1268_p10 = pnand %p1267_p9, %p1266_p7 }
  0x33   : > { %p1273_p6 = por %p1272_p2, %p1271_p0 }
  0x34   : > { %p1269_p11 = pneg %p1268_p10 }
  0x36   : > { %p1274_p5 = pnand %p1273_p6, %p1269_p11 }
  0x38   : > { %1277 = shalt.err (!%p1274_p5)
}
  0x39   : > { %1053 = dma.hbm_to_vmem [thread:$0]  (!%p1537_p8), %s377_s30, 128, %s379_s18, %s367_s22  }
  0x3a   : > { %387 = sbr.rel (%p1466_p3) target bundleno = 518 (0x206), region = 60  ;;  %s1554_s19 = sand.u32 (!%p1466_p3), 1, %s1363_s14  }
  0x3b   : > { %s997_s11 = sshll.u32 (!%p1466_p3), %s1554_s19, 3  ;;  %s390_s28 = scalar_lea.sflag (!%p1466_p3), [#allocation3], %s1554_s19 }
  0x3c   : > { %s1560_s2 = scalar_lea.vmem (!%p1466_p3), [#allocation2], %s997_s11 }
  0x3f   : > { %1338 = dma.done.wait (%p1519_p12), %s390_s28, 128  }
  0x40   : > { %1340 = vsyncadd (%p1519_p12), %s390_s28, 4294967168 }
  0x41   : > { %1342 = dma.done.wait (%p50_p1), [#allocation6], 2080  }
  0x42   : > { %1344 = vsyncadd (%p50_p1), [#allocation6], 4294965216 }
  0x43   : > { %1346 = dma.done.wait (%p50_p1), [#allocation9], 8224  }
  0x44   : > { %1348 = vsyncadd (%p50_p1), [#allocation9], 4294959072 }
  0x45   : > { %1350 = dma.done.wait (%p50_p1), [#allocation12], 6144  }
  0x46   : > { %1352 = vsyncadd (%p50_p1), [#allocation12], 4294961152  ;;  %v471_v0 = vld [vmem:[#allocation5 + $0x70] sm:$0xff]  ;;  %v469_v1 = vld [vmem:[#allocation5 + $0x60] sm:$0xff]  ;;  %vm473_vm0 = vcmask 523264   ;;  %s1007_s22 = sshll.u32 %s1461_s20, 3 }
  0x47   : > { %485 = vmatpush.msra.mxu1 %v471_v0  ;;  %v467_v2 = vld [vmem:[#allocation5 + $0x50] sm:$0xff]  ;;  %v465_v3 = vld [vmem:[#allocation5 + $0x40] sm:$0xff]  ;;  %v472_v21 = vld [vmem:[#allocation5 + $0x78] sm:$0xff]  ;;  %s863_s28 = scalar_lea.hbm %s1638_s10, %s1007_s22  ;;  %s853_s20 = scalar_lea.sflag [#allocation4], %s1554_s19 }
  0x48   : > { %v463_v4 = vld [vmem:[#allocation5 + $0x30] sm:$0xff]  ;;  %v566_v6 = vld [vmem:[#allocation8 + $0xf8] sm:$0xff]  ;;  %v563_v7 = vld [vmem:[#allocation8 + $0xe0] sm:$0xff]  ;;  %s867_s21 = sshll.u32 %s863_s28, 4  ;;  %s1313_s22 = scalar_lea.hbm %s1638_s10, 16  ;;  %s868_s21 = int_to_ptr.hbm [resolvable:$true] %s867_s21 }
  0x49   : > { %486 = vmatpush.msra.mxu1 %v469_v1  ;;  %v565_v5 = vld [vmem:[#allocation8 + $0xf0] sm:$0xff]  ;;  %v564_v8 = vld [vmem:[#allocation8 + $0xe8] sm:$0xff]  ;;  %639 = vmatpush.msra.mxu0 %v566_v6  ;;  %v461_v10 = vld [vmem:[#allocation5 + $0x20] sm:$0xff]  ;;  %s1307_s27 = sshra.s32 %s868_s21, 4  ;;  %s1308_s27 = int_to_ptr.hbm [resolvable:$true] %s1307_s27 }
  0x4a   : > { %599 = vmatpush.msra.mxu2 %v565_v5  ;;  %v561_v9 = vld [vmem:[#allocation8 + $0xd0] sm:$0xff]  ;;  %v562_v11 = vld [vmem:[#allocation8 + $0xd8] sm:$0xff]  ;;  %v559_v13 = vld [vmem:[#allocation8 + $0xc0] sm:$0xff]  ;;  %s1309_s30 = scalar_lea.hbm %s1308_s27, 8  ;;  %p1314_p12 = scmp.lt.s32.totalorder %s1308_s27, %s1638_s10 }
  0x4b   : > { %487 = vmatpush.msra.mxu1 %v467_v2  ;;  %v597_v12 = vld [vmem:[#allocation8 + $0x1f0] sm:$0xff]  ;;  %640 = vmatpush.msra.mxu0 %v564_v8  ;;  %v560_v15 = vld [vmem:[#allocation8 + $0xc8] sm:$0xff]  ;;  %v595_v16 = vld [vmem:[#allocation8 + $0x1e0] sm:$0xff]  ;;  %p1310_p1 = scmp.ne.s32.totalorder %s1308_s27, %s1309_s30  ;;  %p1315_p8 = scmp.lt.s32.totalorder %s1313_s22, %s1309_s30 }
  0x4c   : > { %600 = vmatpush.msra.mxu2 %v563_v7  ;;  %v459_v14 = vld [vmem:[#allocation5 + $0x10] sm:$0xff]  ;;  %619 = vmatpush.msra.mxu3 %v597_v12  ;;  %v457_v19 = vld [vmem:[#allocation5] sm:$0xff]  ;;  %v470_v25 = vld [vmem:[#allocation5 + $0x68] sm:$0xff] }
  0x4d   : > { %488 = vmatpush.msra.mxu1 %v465_v3  ;;  %641 = vmatpush.msra.mxu0 %v562_v11  ;;  %v557_v17 = vld [vmem:[#allocation8 + $0xb0] sm:$0xff]  ;;  %v558_v20 = vld [vmem:[#allocation8 + $0xb8] sm:$0xff]  ;;  %v555_v22 = vld [vmem:[#allocation8 + $0xa0] sm:$0xff]  ;;  %p1311_p3 = pnand %p1310_p1, %p1523_p13  ;;  %p1316_p7 = por %p1315_p8, %p1314_p12 }
  0x4e   : > { %601 = vmatpush.msra.mxu2 %v561_v9  ;;  %v593_v18 = vld [vmem:[#allocation8 + $0x1d0] sm:$0xff]  ;;  %620 = vmatpush.msra.mxu3 %v595_v16  ;;  %v556_v24 = vld [vmem:[#allocation8 + $0xa8] sm:$0xff]  ;;  %v554_v27 = vld [vmem:[#allocation8 + $0x98] sm:$0xff] }
  0x4f   : > { %489 = vmatpush.msra.mxu1 %v463_v4  ;;  %642 = vmatpush.msra.mxu0 %v560_v15  ;;  %v456_v23 = vld [vmem:[%s1560_s2] sm:$0xff]  ;;  %v591_v28 = vld [vmem:[#allocation8 + $0x1c0] sm:$0xff]  ;;  %s455_s2 = scalar_lea.vmem [#allocation13], %s997_s11  ;;  %p1312_p5 = pneg %p1311_p3 }
  0x50   : > { %602 = vmatpush.msra.mxu2 %v559_v13  ;;  %621 = vmatpush.msra.mxu3 %v593_v18  ;;  %v553_v26 = vld [vmem:[#allocation8 + $0x90] sm:$0xff]  ;;  %v551_v30 = vld [vmem:[#allocation8 + $0x80] sm:$0xff]  ;;  %v552_v32 = vld [vmem:[#allocation8 + $0x88] sm:$0xff]  ;;  %s865_s6 = sshll.u32 %s455_s2, 4  ;;  %s866_s6 = int_to_ptr.vmem [resolvable:$true] %s865_s6 }
  0x51   : > { %490 = vmatpush.msra.mxu1 %v461_v10  ;;  %643 = vmatpush.msra.mxu0 %v558_v20  ;;  %v468_v29 = vld [vmem:[#allocation5 + $0x58] sm:$0xff]  ;;  %v466_v31 = vld [vmem:[#allocation5 + $0x48] sm:$0xff]  ;;  %p1317_p9 = pnand %p1316_p7, %p1312_p5 }
  0x52   : > { %603 = vmatpush.msra.mxu2 %v557_v17  ;;  %v589_v33 = vld [vmem:[#allocation8 + $0x1b0] sm:$0xff]  ;;  %622 = vmatpush.msra.mxu3 %v591_v28  ;;  %v550_v35 = vld [vmem:[#allocation8 + $0x78] sm:$0xff]  ;;  %v587_v36 = vld [vmem:[#allocation8 + $0x1a0] sm:$0xff] }
  0x53   : > { %491 = vmatpush.msra.mxu1 %v459_v14  ;;  %644 = vmatpush.msra.mxu0 %v556_v24  ;;  %v549_v34 = vld [vmem:[#allocation8 + $0x70] sm:$0xff]  ;;  %v547_v38 = vld [vmem:[#allocation8 + $0x60] sm:$0xff]  ;;  %v548_v39 = vld [vmem:[#allocation8 + $0x68] sm:$0xff] }
  0x54   : > { %604 = vmatpush.msra.mxu2 %v555_v22  ;;  %v464_v37 = vld [vmem:[#allocation5 + $0x38] sm:$0xff]  ;;  %623 = vmatpush.msra.mxu3 %v589_v33  ;;  %v462_v41 = vld [vmem:[#allocation5 + $0x28] sm:$0xff]  ;;  %v517_v28 = vld [vmem:[#allocation7] sm:$0x3] }
  0x55   : > { %492 = vmatpush.msra.mxu1 %v457_v19  ;;  %645 = vmatpush.msra.mxu0 %v554_v27  ;;  %v585_v40 = vld [vmem:[#allocation8 + $0x190] sm:$0xff]  ;;  %v546_v43 = vld [vmem:[#allocation8 + $0x58] sm:$0xff]  ;;  %v583_v44 = vld [vmem:[#allocation8 + $0x180] sm:$0xff] }
  0x56   : > { %1004 = vmatmul.msk.f32.vlgmr.msra.gmra.mxu1 %vm473_vm0, %v456_v23  ;;  %605 = vmatpush.msra.mxu2 %v553_v26  ;;  %v545_v42 = vld [vmem:[#allocation8 + $0x50] sm:$0xff]  ;;  %v543_v46 = vld [vmem:[#allocation8 + $0x40] sm:$0xff]  ;;  %v544_v47 = vld [vmem:[#allocation8 + $0x48] sm:$0xff] }
  0x57   : > { %505 = vmatpush.msrb.mxu1 %v472_v21  ;;  %646 = vmatpush.msra.mxu0 %v552_v32  ;;  %v460_v45 = vld [vmem:[#allocation5 + $0x18] sm:$0xff]  ;;  %v458_v48 = vld [vmem:[#allocation5 + $0x8] sm:$0xff]  ;;  %v525_v32 = vld [vmem:[%s1631_s3] sm:$0x3] }
  0x58   : > { %606 = vmatpush.msra.mxu2 %v551_v30  ;;  %624 = vmatpush.msra.mxu3 %v587_v36  ;;  %v598_v49 = vld [vmem:[#allocation8 + $0x1f8] sm:$0xff]  ;;  %v596_v50 = vld [vmem:[#allocation8 + $0x1e8] sm:$0xff]  ;;  %v541_v57 = vld [vmem:[#allocation8 + $0x30] sm:$0xff] }
  0x59   : > { %506 = vmatpush.msrb.mxu1 %v470_v25  ;;  %647 = vmatpush.msra.mxu0 %v550_v35  ;;  %v594_v51 = vld [vmem:[#allocation8 + $0x1d8] sm:$0xff]  ;;  %v592_v52 = vld [vmem:[#allocation8 + $0x1c8] sm:$0xff]  ;;  %v581_v58 = vld [vmem:[#allocation8 + $0x170] sm:$0xff] }
  0x5a   : > { %607 = vmatpush.msra.mxu2 %v549_v34  ;;  %625 = vmatpush.msra.mxu3 %v585_v40  ;;  %v590_v53 = vld [vmem:[#allocation8 + $0x1b8] sm:$0xff]  ;;  %v588_v54 = vld [vmem:[#allocation8 + $0x1a8] sm:$0xff]  ;;  %v539_v61 = vld [vmem:[#allocation8 + $0x20] sm:$0xff]  ;;  %v519_v34 = vperm.slane %v517_v28, 0 }
  0x5b   : > { %507 = vmatpush.msrb.mxu1 %v468_v29  ;;  %648 = vmatpush.msra.mxu0 %v548_v39  ;;  %v586_v55 = vld [vmem:[#allocation8 + $0x198] sm:$0xff]  ;;  %v584_v56 = vld [vmem:[#allocation8 + $0x188] sm:$0xff]  ;;  %v579_v62 = vld [vmem:[#allocation8 + $0x160] sm:$0xff] }
  0x5c   : > { %608 = vmatpush.msra.mxu2 %v547_v38  ;;  %626 = vmatpush.msra.mxu3 %v583_v44  ;;  %v542_v59 = vld [vmem:[#allocation8 + $0x38] sm:$0xff]  ;;  %v540_v63 = vld [vmem:[#allocation8 + $0x28] sm:$0xff]  ;;  %v537_v1 = vld [vmem:[#allocation8 + $0x10] sm:$0xff]  ;;  %v527_v38 = vperm.slane %v525_v32, 0 }
  0x5d   : > { %508 = vmatpush.msrb.mxu1 %v466_v31  ;;  %649 = vmatpush.msra.mxu0 %v546_v43  ;;  %v582_v60 = vld [vmem:[#allocation8 + $0x178] sm:$0xff]  ;;  %v580_v0 = vld [vmem:[#allocation8 + $0x168] sm:$0xff]  ;;  %v577_v2 = vld [vmem:[#allocation8 + $0x150] sm:$0xff] }
  0x5e   : > { %609 = vmatpush.msra.mxu2 %v545_v42  ;;  %627 = vmatpush.msra.mxu3 %v581_v58  ;;  %v538_v3 = vld [vmem:[#allocation8 + $0x18] sm:$0xff]  ;;  %v535_v5 = vld [vmem:[#allocation8] sm:$0xff]  ;;  %v536_v7 = vld [vmem:[#allocation8 + $0x8] sm:$0xff] }
  0x5f   : > { %509 = vmatpush.msrb.mxu1 %v464_v37  ;;  %650 = vmatpush.msra.mxu0 %v544_v47  ;;  %v578_v4 = vld [vmem:[#allocation8 + $0x158] sm:$0xff]  ;;  %v575_v6 = vld [vmem:[#allocation8 + $0x140] sm:$0xff]  ;;  %v576_v8 = vld [vmem:[#allocation8 + $0x148] sm:$0xff]  ;;  %v528_v47 = vperm.slane %v525_v32, 1  ;;  %v696_v32 = vlaneseq }
  0x60   : > { %610 = vmatpush.msra.mxu2 %v543_v46  ;;  %628 = vmatpush.msra.mxu3 %v579_v62  ;;  %v573_v9 = vld [vmem:[#allocation8 + $0x130] sm:$0xff]  ;;  %v574_v10 = vld [vmem:[#allocation8 + $0x138] sm:$0xff]  ;;  %v571_v11 = vld [vmem:[#allocation8 + $0x120] sm:$0xff]  ;;  %v520_v46 = vperm.slane %v517_v28, 1 }
  0x61   : > { %510 = vmatpush.msrb.mxu1 %v462_v41  ;;  %651 = vmatpush.msra.mxu0 %v542_v59  ;;  %v572_v12 = vld [vmem:[#allocation8 + $0x128] sm:$0xff]  ;;  %v569_v13 = vld [vmem:[#allocation8 + $0x110] sm:$0xff]  ;;  %v570_v14 = vld [vmem:[#allocation8 + $0x118] sm:$0xff] }
  0x62   : > { %611 = vmatpush.msra.mxu2 %v541_v57  ;;  %629 = vmatpush.msra.mxu3 %v577_v2  ;;  %v567_v15 = vld [vmem:[#allocation8 + $0x100] sm:$0xff]  ;;  %v568_v16 = vld [vmem:[#allocation8 + $0x108] sm:$0xff]  ;;  %v724_v20 = vld [vmem:[#allocation11 + $0x70] sm:$0xff] }
  0x63   : > { %511 = vmatpush.msrb.mxu1 %v460_v45  ;;  %652 = vmatpush.msra.mxu0 %v540_v63  ;;  %v725_v17 = vld [vmem:[#allocation11 + $0x78] sm:$0xff]  ;;  %v770_v21 = vld [vmem:[#allocation11 + $0xf0] sm:$0xff]  ;;  %v769_v24 = vld [vmem:[#allocation11 + $0xe8] sm:$0xff] }
  0x64   : > { %612 = vmatpush.msra.mxu2 %v539_v61  ;;  %630 = vmatpush.msra.mxu3 %v575_v6  ;;  %v771_v18 = vld [vmem:[#allocation11 + $0xf8] sm:$0xff]  ;;  %v808_v22 = vld [vmem:[#allocation11 + $0x170] sm:$0xff]  ;;  %v807_v25 = vld [vmem:[#allocation11 + $0x168] sm:$0xff] }
  0x65   : > { %512 = vmatpush.msrb.mxu1 %v458_v48  ;;  %653 = vmatpush.msra.mxu0 %v538_v3  ;;  %v809_v19 = vld [vmem:[#allocation11 + $0x178] sm:$0xff]  ;;  %v722_v26 = vld [vmem:[#allocation11 + $0x60] sm:$0xff]  ;;  %v720_v35 = vld [vmem:[#allocation11 + $0x50] sm:$0xff] }
  0x66   : > { %1005 = vmatmul.msk.f32.vlgmr.msrb.gmra.mxu1 %vm473_vm0, %v456_v23  ;;  %613 = vmatpush.msra.mxu2 %v537_v1  ;;  %v723_v23 = vld [vmem:[#allocation11 + $0x68] sm:$0xff]  ;;  %v768_v27 = vld [vmem:[#allocation11 + $0xe0] sm:$0xff]  ;;  %v721_v30 = vld [vmem:[#allocation11 + $0x58] sm:$0xff] }
  0x67   : > { %659 = vmatpush.msra.mxu1 %v598_v49  ;;  %654 = vmatpush.msra.mxu0 %v536_v7  ;;  %v806_v29 = vld [vmem:[#allocation11 + $0x160] sm:$0xff]  ;;  %v767_v31 = vld [vmem:[#allocation11 + $0xd8] sm:$0xff]  ;;  %v766_v36 = vld [vmem:[#allocation11 + $0xd0] sm:$0xff] }
  0x68   : > { %614 = vmatpush.msra.mxu2 %v535_v5  ;;  %631 = vmatpush.msra.mxu3 %v573_v9  ;;  %v805_v33 = vld [vmem:[#allocation11 + $0x158] sm:$0xff]  ;;  %v804_v37 = vld [vmem:[#allocation11 + $0x150] sm:$0xff]  ;;  %v719_v39 = vld [vmem:[#allocation11 + $0x48] sm:$0xff] }
  0x69   : > { %660 = vmatpush.msra.mxu1 %v596_v50  ;;  %810 = vmatpush.msrb.mxu0 %v809_v19  ;;  %v765_v40 = vld [vmem:[#allocation11 + $0xc8] sm:$0xff]  ;;  %v801_v57 = vld [vmem:[#allocation11 + $0x138] sm:$0xff]  ;;  %v716_v58 = vld [vmem:[#allocation11 + $0x30] sm:$0xff] }
  0x6a   : > { %632 = vmatpush.msra.mxu3 %v571_v11  ;;  %726 = vmatpush.msrb.mxu2 %v725_v17  ;;  %v803_v42 = vld [vmem:[#allocation11 + $0x148] sm:$0xff]  ;;  %v762_v59 = vld [vmem:[#allocation11 + $0xb0] sm:$0xff]  ;;  %v760_v1 = vld [vmem:[#allocation11 + $0xa0] sm:$0xff] }
  0x6b   : > { %661 = vmatpush.msra.mxu1 %v594_v51  ;;  %811 = vmatpush.msrb.mxu0 %v808_v22  ;;  %v715_v61 = vld [vmem:[#allocation11 + $0x28] sm:$0xff]  ;;  %v798_v2 = vld [vmem:[#allocation11 + $0x120] sm:$0xff]  ;;  %v713_v3 = vld [vmem:[#allocation11 + $0x18] sm:$0xff] }
  0x6c   : > { %633 = vmatpush.msra.mxu3 %v569_v13  ;;  %727 = vmatpush.msrb.mxu2 %v724_v20  ;;  %v761_v62 = vld [vmem:[#allocation11 + $0xa8] sm:$0xff]  ;;  %v797_v5 = vld [vmem:[#allocation11 + $0x118] sm:$0xff]  ;;  %v712_v6 = vld [vmem:[#allocation11 + $0x10] sm:$0xff] }
  0x6d   : > { %662 = vmatpush.msra.mxu1 %v592_v52  ;;  %812 = vmatpush.msrb.mxu0 %v807_v25  ;;  %v718_v52 = vld [vmem:[#allocation11 + $0x40] sm:$0xff]  ;;  %v799_v63 = vld [vmem:[#allocation11 + $0x128] sm:$0xff]  ;;  %v758_v7 = vld [vmem:[#allocation11 + $0x90] sm:$0xff] }
  0x6e   : > { %634 = vmatpush.msra.mxu3 %v567_v15  ;;  %728 = vmatpush.msrb.mxu2 %v723_v23  ;;  %v711_v9 = vld [vmem:[#allocation11 + $0x8] sm:$0xff]  ;;  %v756_v13 = vld [vmem:[#allocation11 + $0x80] sm:$0xff] }
  0x6f   : > { %663 = vmatpush.msra.mxu1 %v590_v53  ;;  %813 = vmatpush.msrb.mxu0 %v806_v29  ;;  %v764_v53 = vld [vmem:[#allocation11 + $0xc0] sm:$0xff]  ;;  %v795_v11 = vld [vmem:[#allocation11 + $0x108] sm:$0xff] }
  0x70   : > { %772 = vmatpush.msrb.mxu3 %v771_v18  ;;  %729 = vmatpush.msrb.mxu2 %v722_v26  ;;  %v679_v15 = vld [vmem:[%s1633_s5] sm:$0x3] }
  0x71   : > { %664 = vmatpush.msra.mxu1 %v588_v54  ;;  %814 = vmatpush.msrb.mxu0 %v805_v33  ;;  %v802_v54 = vld [vmem:[#allocation11 + $0x140] sm:$0xff]  ;;  %v682_v17 = vperm.slane %v679_v15, 1  ;;  %v681_v23 = vperm.slane %v679_v15, 0  ;;  %v697_v33 = vshrl.u32 %v696_v32, 7 }
  0x72   : > { %773 = vmatpush.msrb.mxu3 %v770_v21  ;;  %730 = vmatpush.msrb.mxu2 %v721_v30 }
  0x73   : > { %665 = vmatpush.msra.mxu1 %v586_v55  ;;  %815 = vmatpush.msrb.mxu0 %v804_v37  ;;  %v717_v55 = vld [vmem:[#allocation11 + $0x38] sm:$0xff] }
  0x74   : > { %774 = vmatpush.msrb.mxu3 %v769_v24  ;;  %731 = vmatpush.msrb.mxu2 %v720_v35 }
  0x75   : > { %666 = vmatpush.msra.mxu1 %v584_v56  ;;  %816 = vmatpush.msrb.mxu0 %v803_v42  ;;  %v763_v56 = vld [vmem:[#allocation11 + $0xb8] sm:$0xff] }
  0x76   : > { %775 = vmatpush.msrb.mxu3 %v768_v27  ;;  %732 = vmatpush.msrb.mxu2 %v719_v39 }
  0x77   : > { %667 = vmatpush.msra.mxu1 %v582_v60  ;;  %817 = vmatpush.msrb.mxu0 %v802_v54  ;;  %v800_v60 = vld [vmem:[#allocation11 + $0x130] sm:$0xff] }
  0x78   : > { %776 = vmatpush.msrb.mxu3 %v767_v31  ;;  %733 = vmatpush.msrb.mxu2 %v718_v52 }
  0x79   : > { %668 = vmatpush.msra.mxu1 %v580_v0  ;;  %818 = vmatpush.msrb.mxu0 %v801_v57  ;;  %v714_v0 = vld [vmem:[#allocation11 + $0x20] sm:$0xff] }
  0x7a   : > { %777 = vmatpush.msrb.mxu3 %v766_v36  ;;  %734 = vmatpush.msrb.mxu2 %v717_v55 }
  0x7b   : > { %669 = vmatpush.msra.mxu1 %v578_v4  ;;  %819 = vmatpush.msrb.mxu0 %v800_v60  ;;  %v759_v4 = vld [vmem:[#allocation11 + $0x98] sm:$0xff] }
  0x7c   : > { %778 = vmatpush.msrb.mxu3 %v765_v40  ;;  %735 = vmatpush.msrb.mxu2 %v716_v58 }
  0x7d   : > { %670 = vmatpush.msra.mxu1 %v576_v8  ;;  %820 = vmatpush.msrb.mxu0 %v799_v63  ;;  %v796_v8 = vld [vmem:[#allocation11 + $0x110] sm:$0xff] }
  0x7e   : > { %779 = vmatpush.msrb.mxu3 %v764_v53  ;;  %736 = vmatpush.msrb.mxu2 %v715_v61 }
  0x7f   : > { %671 = vmatpush.msra.mxu1 %v574_v10  ;;  %821 = vmatpush.msrb.mxu0 %v798_v2  ;;  %v757_v10 = vld [vmem:[#allocation11 + $0x88] sm:$0xff] }
  0x80   : > { %780 = vmatpush.msrb.mxu3 %v763_v56  ;;  %737 = vmatpush.msrb.mxu2 %v714_v0 }
  0x81   : > { %672 = vmatpush.msra.mxu1 %v572_v12  ;;  %822 = vmatpush.msrb.mxu0 %v797_v5  ;;  %v710_v12 = vld [vmem:[#allocation11] sm:$0xff] }
  0x82   : > { %781 = vmatpush.msrb.mxu3 %v762_v59  ;;  %738 = vmatpush.msrb.mxu2 %v713_v3 }
  0x83   : > { %673 = vmatpush.msra.mxu1 %v570_v14  ;;  %823 = vmatpush.msrb.mxu0 %v796_v8  ;;  %v794_v14 = vld [vmem:[#allocation11 + $0x100] sm:$0xff] }
  0x84   : > { %782 = vmatpush.msrb.mxu3 %v761_v62  ;;  %739 = vmatpush.msrb.mxu2 %v712_v6 }
  0x85   : > { %674 = vmatpush.msra.mxu1 %v568_v16  ;;  %824 = vmatpush.msrb.mxu0 %v795_v11  ;;  %v687_v16 = vld [vmem:[#allocation10] sm:$0x3] }
  0x86   : > { %783 = vmatpush.msrb.mxu3 %v760_v1  ;;  %740 = vmatpush.msrb.mxu2 %v711_v9  ;;  %v690_v21 = vperm.slane %v687_v16, 1  ;;  %v689_v28 = vperm.slane %v687_v16, 0 }
  0x87   : > { %825 = vmatpush.msrb.mxu0 %v794_v14 }
  0x88   : > { %784 = vmatpush.msrb.mxu3 %v759_v4  ;;  %741 = vmatpush.msrb.mxu2 %v710_v12 }
  0x8a   : > { %785 = vmatpush.msrb.mxu3 %v758_v7 }
  0x8c   : > { %786 = vmatpush.msrb.mxu3 %v757_v10 }
  0x8e   : > { %787 = vmatpush.msrb.mxu3 %v756_v13 }
  0xd3   : > { %v494_v41 = vpop.f32.mrf.mxu1 }
  0xd4   : > { %v523_v43 = vmul.f32 %v519_v34, %v494_v41  ;;  %v702_v34 = vand.u32 7, %v697_v33 }
  0xd6   : > { %v531_v44 = vadd.f32 %v527_v38, %v523_v43  ;;  %v747_v35 = vadd.s32 4294967295, %v702_v34  ;;  %v831_v37 = vadd.s32 1, %v702_v34 }
  0xd8   : > { %v533_v45 = vmax.f32 %v531_v44, 0.0  ;;  %vm748_vm1 = vcmp.ge.s32.totalorder %v747_v35, 0  ;;  %vm833_vm2 = vcmp.lt.s32.totalorder %v831_v37, 8  ;;  %v1111_v44 = vld [vmem:[%s1636_s8] ss:$0 sm:$0xff] }
  0xda   : > { %615 = vmatmul.f32.vlgmr.msra.gmra.mxu2 %v533_v45  ;;  %655 = vmatmul.f32.vlgmr.msra.gmra.mxu0 %v533_v45 }
  0xe3   : > { %v514_v48 = vpop.f32.mrf.mxu1 }
  0xe4   : > { %v524_v49 = vmul.f32 %v520_v46, %v514_v48 }
  0xe6   : > { %v532_v50 = vadd.f32 %v528_v47, %v524_v49  ;;  %v1112_v47 = vld [vmem:[%s1637_s9] ss:$0 sm:$0xff] }
  0xe8   : > { %v534_v51 = vmax.f32 %v532_v50, 0.0 }
  0xea   : > { %635 = vmatmul.f32.vlgmr.msra.gmra.mxu3 %v534_v51  ;;  %675 = vmatmul.f32.vlgmr.msra.gmra.mxu1 %v534_v51 }
 0x157   : > { %v656_v18 = vpop.f32.mrf.mxu0 }
 0x15d   : > { %v616_v25 = vpop.f32.mrf.mxu2 }
 0x167   : > { %v676_v19 = vpop.f32.mrf.mxu1 }
 0x168   : > { %v677_v20 = vadd.f32 %v676_v19, %v656_v18 }
 0x16a   : > { %v686_v22 = vmul.f32 %v682_v17, %v677_v20 }
 0x16c   : > { %v694_v24 = vadd.f32 %v690_v21, %v686_v22 }
 0x16d   : > { %v636_v26 = vpop.f32.mrf.mxu3 }
 0x16e   : > { %v637_v27 = vadd.f32 %v636_v26, %v616_v25  ;;  %v695_v29 = vmax.f32 %v694_v24, 0.0 }
 0x170   : > { %v685_v30 = vmul.f32 %v681_v23, %v637_v27  ;;  %742 = vmatmul.f32.vlgmr.msrb.gmra.mxu2 %v695_v29  ;;  %788 = vmatmul.f32.vlgmr.msrb.gmra.mxu3 %v695_v29 }
 0x171   : > { %826 = vmatmul.f32.vlgmr.msrb.gmra.mxu0 %v695_v29 }
 0x172   : > { %v693_v31 = vadd.f32 %v689_v28, %v685_v30 }
 0x1ee   : > { %v827_v36 = vpop.f32.mrf.mxu0 }
 0x1ef   : > { %v830_v39 = vrot.slane %v827_v36, 1 }
 0x1f1   : > { %v837_v45 = vsel %vm833_vm2, %v830_v39, 0.0 }
 0x1f3   : > { %v743_v38 = vpop.f32.mrf.mxu2  ;;  %v789_v42 = vpop.f32.mrf.mxu3 }
 0x1f4   : > { %v746_v40 = vrot.slane %v743_v38, 7 }
 0x1f6   : > { %v753_v41 = vsel %vm748_vm1, %v746_v40, 0.0 }
 0x1f7   : > { %v792_v43 = vadd.f32 %v789_v42, %v753_v41 }
 0x1f9   : > { %v838_v46 = vadd.f32 %v837_v45, %v792_v43 }
 0x1fb   : > { %v843_v48 = vmul.f32 %v1111_v44, %v838_v46 }
 0x1fd   : > { %v848_v49 = vadd.f32 %v1112_v47, %v843_v48 }
 0x1ff   : > { %v849_v50 = vadd.f32 %v848_v49, %v693_v31 }
 0x201   : > { %v850_v51 = vmax.f32 %v849_v50, 0.0 }
 0x203   : > { %851 = vst [vmem:[%s455_s2] sm:$0xff] %v850_v51 }
 0x204   : > { %1320 = shalt.err (!%p1317_p9)
}
 0x205   : > { %1032 = dma.vmem_to_hbm [thread:$0]  (%p1523_p13), %s866_s6, 128, %s868_s21, %s853_s20  }
 0x206 PF: > { %s879_s19 = sand.u32 1, %s1359_s13   ;;  %p1653_p10 = scmp.ge.s32.totalorder %s1371_s16, 2 }
 0x207   : > { %s880_s26 = scalar_lea.sflag [#allocation4], %s879_s19 }
 0x208   : > { %p1055_p11 = pnand %p1653_p10, %p1528_p4 }
 0x20a   : > { %p1056_p0 = pneg %p1055_p11 }
 0x20c   : > { %1354 = dma.done.wait (%p1056_p0), %s880_s26, 128  }
 0x20d   : > { %1356 = vsyncadd (%p1056_p0), %s880_s26, 4294967168  ;;  %p26_p2 = scmp.ge.s32.totalorder %s1503_s17, 4   ;;  %s1654_s13 = smov %s1363_s14 }
 0x20e   : > { %s1655_s14 = smov %s1367_s15  ;;  %s1656_s15 = smov %s1515_s24 }
 0x20f   : > { %s1657_s16 = smov %s1503_s17  ;;  %28 = sbr.rel (!%p26_p2) target bundleno = 13 (0xd), region = 127 }
 0x214   :  { %886 = vsyncpa [#allocation3], 1 }
 0x215   :  { %888 = vsyncpa [#allocation3 + $0x1], 1 }
 0x216   :  { %889 = vsyncpa [#allocation6], 1 }
 0x217   :  { %890 = vsyncpa [#allocation9], 1 }
 0x218   :  { %891 = vsyncpa [#allocation12], 1 }
 0x219   :  { %892 = vsyncpa [#allocation4], 1 }
 0x21a   :  { %894 = vsyncpa [#allocation4 + $0x1], 1 }

</bundles_post_ra>
